<compile_context>
chip_gen: v7x
topology: tpu7x:2x2x1
jax: 0.10.0
libtpu: 0.0.40
codegen_flags: <defaults>
</compile_context>

<pallas_src>
import functools

import jax
import jax.numpy as jnp
from jax.experimental import pallas as pl
from jax.experimental.pallas import tpu as pltpu


def _round_up(x, m):
    return ((x + m - 1) // m) * m


def _pad2(a, rows, cols):
    return jnp.pad(a, ((0, rows - a.shape[0]), (0, cols - a.shape[1])))


def _vmem_limit_bytes():
    """Per-generation VMEM budget: ~3/4 of physical capacity, capped at 100 MiB."""
    try:
        cap = pltpu.get_tpu_info().vmem_capacity_bytes
    except Exception:
        cap = 64 * 1024 * 1024          # conservative fallback (v7x physical)
    return int(min(cap * 3 // 4, 100 * 1024 * 1024))


def _choose_tiles(n):
    """Decoupled row (TM) / reduction (TK) tiles, both (8,128)-aligned."""
    n128 = _round_up(n, 128)
    if n128 <= 1024:
        tk = n128
        tm = n128 // 2 if n128 >= 256 else n128   # >= 2 row blocks helps v7x 2-TC
        return tm, tk
    tm, tk = 2048, 1024
    while tm > 512 and _round_up(n128, tm) // tm < 2:
        tm //= 2                                   # keep the parallel axis split
    return tm, tk


def _maybe_buffered(shape, index_map, n_steps, nbuf=3):
    """Deeper pipelining on long grids (hide DMA behind the epilogue step)."""
    if n_steps > 2:
        try:
            return pl.BlockSpec(shape, index_map, pipeline_mode=pl.Buffered(nbuf))
        except Exception:   # pipeline_mode unavailable -> default double buffer
            pass
    return pl.BlockSpec(shape, index_map)


# ----------------------------------------------------------------------------
# Pallas kernels
# ----------------------------------------------------------------------------
def gin_layer_kernel(adj_ref, x_ref, xs_ref, w1_ref, b1_ref, w2_ref, b2_ref,
                     eps_ref, o_ref, acc_ref, *, tk, x_resident):
    """One GIN layer row tile: K-accumulated aggregation + fused MLP/BN/ReLU."""
    k = pl.program_id(1)

    @pl.when(k == 0)
    def _init():
        acc_ref[...] = jnp.zeros_like(acc_ref)

    # Neighbour aggregation: int8 A tile cast to bf16 (VPU), bf16 MXU matmul,
    # f32 accumulation in VMEM scratch.
    adj = adj_ref[...].astype(jnp.bfloat16)
    if x_resident:
        start = pl.multiple_of(k * tk, tk)
        xk = x_ref[pl.ds(start, tk), :]       # resident slab: slice the K chunk
    else:
        xk = x_ref[...]                       # streamed (TK, F) tile
    acc_ref[...] += jnp.dot(adj, xk, preferred_element_type=jnp.float32)

    # Epilogue runs once per output row tile (last K step only).
    @pl.when(k == pl.num_programs(1) - 1)
    def _fin():
        eps = eps_ref[0, 0]
        # exact (1+eps)*x_i self term, kept out of the int8 adjacency.
        agg = acc_ref[...] + (1.0 + eps) * xs_ref[...].astype(jnp.float32)
        h = jnp.dot(agg.astype(jnp.bfloat16), w1_ref[...],
                    preferred_element_type=jnp.float32) + b1_ref[...]
        h = jnp.maximum(h, 0.0)
        # eval-mode BatchNorm is pre-folded into w2/b2 by the wrapper.
        h = jnp.dot(h.astype(jnp.bfloat16), w2_ref[...],
                    preferred_element_type=jnp.float32) + b2_ref[...]
        o_ref[...] = jnp.maximum(h, 0.0).astype(o_ref.dtype)


def readout_classifier_kernel(p_ref, h_ref, wc1_ref, bc1_ref, wc2_ref, bc2_ref,
                              o_ref, acc_ref):
    """global_add_pool accumulated over node tiles + classifier MLP epilogue."""
    k = pl.program_id(0)

    @pl.when(k == 0)
    def _init():
        acc_ref[...] = jnp.zeros_like(acc_ref)

    acc_ref[...] += jnp.dot(p_ref[...], h_ref[...],
                            preferred_element_type=jnp.float32)

    @pl.when(k == pl.num_programs(0) - 1)
    def _fin():
        z = jnp.dot(acc_ref[...].astype(jnp.bfloat16), wc1_ref[...],
                    preferred_element_type=jnp.float32) + bc1_ref[...]
        z = jnp.maximum(z, 0.0)
        # dropout is identity in eval mode.
        o_ref[...] = (jnp.dot(z.astype(jnp.bfloat16), wc2_ref[...],
                              preferred_element_type=jnp.float32) + bc2_ref[...])


# ----------------------------------------------------------------------------
# pallas_call wrappers
# ----------------------------------------------------------------------------
def _gin_layer(adj, x, eps, w1, b1, w2, b2, *, tm, tk, x_resident, vmem_limit):
    n_pad = adj.shape[0]
    f_pad = x.shape[1]
    h_pad = w2.shape[1]
    n_row, n_k = n_pad // tm, n_pad // tk
    grid = (n_row, n_k)

    adj_spec = _maybe_buffered((tm, tk), lambda i, k: (i, k), n_k)
    if x_resident:
        x_spec = pl.BlockSpec((n_pad, f_pad), lambda i, k: (0, 0))   # resident slab
    else:
        x_spec = _maybe_buffered((tk, f_pad), lambda i, k: (k, 0), n_k)

    flops = (2 * n_pad * n_pad * f_pad          # aggregation
             + 2 * n_pad * f_pad * h_pad        # MLP linear 1
             + 2 * n_pad * h_pad * h_pad)       # MLP linear 2 (BN folded)
    x_reads = 1 if x_resident else n_row
    bytes_accessed = (n_pad * n_pad                           # int8 A_hat (once)
                      + 2 * n_pad * f_pad * (x_reads + 1)     # bf16 x (+ self term)
                      + 2 * n_pad * h_pad                     # bf16 output
                      + 2 * (w1.size + w2.size)
                      + 4 * (b1.size + b2.size) + 4)

    kernel = functools.partial(gin_layer_kernel, tk=tk, x_resident=x_resident)

    return pl.pallas_call(
        kernel,
        out_shape=jax.ShapeDtypeStruct((n_pad, h_pad), jnp.bfloat16),
        grid_spec=pltpu.PrefetchScalarGridSpec(
            num_scalar_prefetch=0,
            grid=grid,
            in_specs=[
                adj_spec,                                            # A (int8)
                x_spec,                                              # x (bf16)
                pl.BlockSpec((tm, f_pad), lambda i, k: (i, 0)),      # x self term
                pl.BlockSpec((f_pad, h_pad), lambda i, k: (0, 0)),   # w1 (bf16)
                pl.BlockSpec((1, h_pad), lambda i, k: (0, 0)),       # b1 (f32)
                pl.BlockSpec((h_pad, h_pad), lambda i, k: (0, 0)),   # w2*bn_scale
                pl.BlockSpec((1, h_pad), lambda i, k: (0, 0)),       # b2 folded
                pl.BlockSpec(memory_space=pltpu.MemorySpace.SMEM),   # eps scalar
            ],
            out_specs=pl.BlockSpec((tm, h_pad), lambda i, k: (i, 0)),
            scratch_shapes=[pltpu.VMEM((tm, f_pad), jnp.float32)],
        ),
        compiler_params=pltpu.CompilerParams(
            dimension_semantics=("parallel", "arbitrary"),
            vmem_limit_bytes=vmem_limit,
        ),
        cost_estimate=pl.CostEstimate(flops=flops, transcendentals=0,
                                      bytes_accessed=bytes_accessed),
    )(adj, x, x, w1, b1, w2, b2, eps)


def _readout_classify(pool, h, wc1, bc1, wc2, bc2, *, tn, vmem_limit):
    g_pad, n_pad = pool.shape
    h_pad = h.shape[1]
    c_pad = wc2.shape[1]
    n_k = n_pad // tn
    return pl.pallas_call(
        readout_classifier_kernel,
        out_shape=jax.ShapeDtypeStruct((g_pad, c_pad), jnp.float32),
        grid_spec=pltpu.PrefetchScalarGridSpec(
            num_scalar_prefetch=0,
            grid=(n_k,),
            in_specs=[
                _maybe_buffered((g_pad, tn), lambda k: (0, k), n_k),  # pool tile
                _maybe_buffered((tn, h_pad), lambda k: (k, 0), n_k),  # h tile
                pl.BlockSpec((h_pad, h_pad), lambda k: (0, 0)),       # wc1 (bf16)
                pl.BlockSpec((1, h_pad), lambda k: (0, 0)),           # bc1
                pl.BlockSpec((h_pad, c_pad), lambda k: (0, 0)),       # wc2 (bf16)
                pl.BlockSpec((1, c_pad), lambda k: (0, 0)),           # bc2
            ],
            out_specs=pl.BlockSpec((g_pad, c_pad), lambda k: (0, 0)),
            scratch_shapes=[pltpu.VMEM((g_pad, h_pad), jnp.float32)],
        ),
        compiler_params=pltpu.CompilerParams(
            dimension_semantics=("arbitrary",),
            vmem_limit_bytes=vmem_limit,
        ),
    )(pool, h, wc1, bc1, wc2, bc2)


# ----------------------------------------------------------------------------
# Parameter construction (deterministic, in-script)
# ----------------------------------------------------------------------------
def init_gnn_params(key, input_dim, hidden_dim, num_classes, num_layers):
    params = {"layers": [], "eps": jnp.zeros((1, 1), jnp.float32)}
    bn_eps = 1e-5
    for i in range(num_layers):
        d_in = input_dim if i == 0 else hidden_dim
        key, k1, k2 = jax.random.split(key, 3)
        w1 = (jax.random.normal(k1, (d_in, hidden_dim), jnp.float32)
              * (1.0 / jnp.sqrt(d_in)))
        w2 = (jax.random.normal(k2, (hidden_dim, hidden_dim), jnp.float32)
              * (1.0 / jnp.sqrt(hidden_dim)))
        b1 = jnp.zeros((1, hidden_dim), jnp.float32)
        b2 = jnp.zeros((1, hidden_dim), jnp.float32)
        # BatchNorm1d (eval): gamma=1, beta=0, running_mean=0, running_var=1
        gamma = jnp.ones((hidden_dim,), jnp.float32)
        beta = jnp.zeros((hidden_dim,), jnp.float32)
        run_mean = jnp.zeros((hidden_dim,), jnp.float32)
        run_var = jnp.ones((hidden_dim,), jnp.float32)
        scale = (gamma / jnp.sqrt(run_var + bn_eps)).reshape(1, hidden_dim)
        shift = (beta - run_mean * scale[0]).reshape(1, hidden_dim)
        params["layers"].append(dict(w1=w1, b1=b1, w2=w2, b2=b2,
                                     scale=scale, shift=shift))
    key, k1, k2 = jax.random.split(key, 3)
    params["wc1"] = (jax.random.normal(k1, (hidden_dim, hidden_dim), jnp.float32)
                     * (1.0 / jnp.sqrt(hidden_dim)))
    params["bc1"] = jnp.zeros((1, hidden_dim), jnp.float32)
    params["wc2"] = (jax.random.normal(k2, (hidden_dim, num_classes), jnp.float32)
                     * (1.0 / jnp.sqrt(hidden_dim)))
    params["bc2"] = jnp.zeros((1, num_classes), jnp.float32)
    return params


# ----------------------------------------------------------------------------
# GNN forward (glue in plain JAX, hot path in Pallas)
# ----------------------------------------------------------------------------
@functools.partial(jax.jit, static_argnames=("num_graphs",))
def gnn_forward(params, x, edge_index, batch, num_graphs):
    n, f_in = x.shape
    hidden = params["layers"][0]["w2"].shape[1]
    num_classes = params["wc2"].shape[1]

    tm, tk = _choose_tiles(n)
    n_pad = _round_up(n, max(tm, tk))
    f_pad = _round_up(f_in, 128)
    h_pad = _round_up(hidden, 128)
    g_pad = _round_up(num_graphs, 8)
    c_pad = _round_up(num_classes, 128)

    vmem_limit = _vmem_limit_bytes()
    # Resident-x option: keep the whole activation slab in VMEM (eliminates the
    # n_pad/TM-fold re-streaming of x) when it fits this generation's VMEM with
    # ample headroom for A tiles / accumulators / output buffers.
    slab = n_pad * max(f_pad, h_pad) * 2
    x_resident = 2 * slab + (16 << 20) <= vmem_limit

    # Sparse edge counts scattered straight into an int8 HBM buffer (single
    # pass, no f32 N^2 intermediate).  The (1+eps) self term is applied exactly
    # inside the kernel epilogue instead of being folded onto the diagonal.
    src, dst = edge_index[0], edge_index[1]
    adj = jnp.zeros((n_pad, n_pad), jnp.int8).at[dst, src].add(1)

    eps = params["eps"].reshape(1, 1).astype(jnp.float32)

    h = _pad2(x, n_pad, f_pad).astype(jnp.bfloat16)

    # TODO(synk): for realistic sparse graphs replace the dense int8 A @ X with
    # a scalar-prefetched CSR gather-accumulate (PrefetchScalarGridSpec).
    for lp in params["layers"]:
        in_pad = h.shape[1]
        w1 = _pad2(lp["w1"], in_pad, h_pad).astype(jnp.bfloat16)
        b1 = _pad2(lp["b1"], 1, h_pad).astype(jnp.float32)
        # Fold eval-mode BatchNorm into the second linear:
        #   w2' = w2 * scale (column-wise),  b2' = b2 * scale + shift
        w2 = _pad2(lp["w2"] * lp["scale"], h_pad, h_pad).astype(jnp.bfloat16)
        b2 = _pad2(lp["b2"] * lp["scale"] + lp["shift"], 1, h_pad).astype(jnp.float32)
        h = _gin_layer(adj, h, eps, w1, b1, w2, b2, tm=tm, tk=tk,
                       x_resident=x_resident, vmem_limit=vmem_limit)

    # global add-pool matrix P[g, i] = 1 iff batch[i] == g (0/1, bf16-exact)
    pool = (jnp.zeros((g_pad, n_pad), jnp.bfloat16)
            .at[batch, jnp.arange(n)].set(1.0))

    wc1 = _pad2(params["wc1"], h_pad, h_pad).astype(jnp.bfloat16)
    bc1 = _pad2(params["bc1"], 1, h_pad).astype(jnp.float32)
    wc2 = _pad2(params["wc2"], h_pad, c_pad).astype(jnp.bfloat16)
    bc2 = _pad2(params["bc2"], 1, c_pad).astype(jnp.float32)
    logits_pad = _readout_classify(pool, h, wc1, bc1, wc2, bc2,
                                   tn=tm, vmem_limit=vmem_limit)
    return logits_pad[:num_graphs, :num_classes]


# ----------------------------------------------------------------------------
# pure-JAX f32 reference (same math, for a correctness spot-check)
# ----------------------------------------------------------------------------
def gnn_reference(params, x, edge_index, batch, num_graphs):
    n = x.shape[0]
    eps = params["eps"][0, 0]
    src, dst = edge_index[0], edge_index[1]
    adj = jnp.zeros((n, n), jnp.float32).at[dst, src].add(1.0)
    a_hat = adj + (1.0 + eps) * jnp.eye(n, dtype=jnp.float32)
    h = x
    for lp in params["layers"]:
        agg = a_hat @ h
        z = jnp.maximum(agg @ lp["w1"] + lp["b1"], 0.0) @ lp["w2"] + lp["b2"]
        z = z * lp["scale"] + lp["shift"]
        h = jnp.maximum(z, 0.0)
    pool = jax.nn.one_hot(batch, num_graphs, dtype=jnp.float32).T
    pooled = pool @ h
    z = jnp.maximum(pooled @ params["wc1"] + params["bc1"], 0.0)
    return z @ params["wc2"] + params["bc2"]


# ----------------------------------------------------------------------------
if __name__ == "__main__":
    key = jax.random.PRNGKey(0)

    # small synthetic graph batch: 2 graphs, 8 nodes each (ring graphs)
    num_nodes = 16
    input_dim = 16
    hidden_dim = 32
    num_classes = 4
    num_layers = 3
    num_graphs = 2
    nodes_per_graph = num_nodes // num_graphs

    key, kx, kp = jax.random.split(key, 3)
    x = jax.random.normal(kx, (num_nodes, input_dim), jnp.float32)

    # edge_index (2, E): bidirectional ring within each 8-node graph
    srcs, dsts = [], []
    for g in range(num_graphs):
        base = g * nodes_per_graph
        for i in range(nodes_per_graph):
            a, b = base + i, base + (i + 1) % nodes_per_graph
            srcs += [a, b]
            dsts += [b, a]
    edge_index = jnp.array([srcs, dsts], dtype=jnp.int32)
    batch = jnp.repeat(jnp.arange(num_graphs, dtype=jnp.int32), nodes_per_graph)

    params = init_gnn_params(kp, input_dim, hidden_dim, num_classes, num_layers)

    logits = gnn_forward(params, x, edge_index, batch, num_graphs)
    jax.block_until_ready(logits)
    assert logits.shape == (num_graphs, num_classes)
    assert bool(jnp.all(jnp.isfinite(logits)))

    # loose check vs f32 reference (kernel uses bf16 operands / f32 accumulation)
    ref = gnn_reference(params, x, edge_index, batch, num_graphs)
    max_err = float(jnp.max(jnp.abs(logits - ref)))
    tol = 5e-2 * max(1.0, float(jnp.max(jnp.abs(ref))))
    assert max_err <= tol, f"max_err={max_err} tol={tol}"

    print("KERNEL_OK")
</pallas_src>

<mosaic_0001>
module attributes {stable_mosaic.version = 11 : i64} {
  func.func @gin_layer_kernel(%arg0: i32, %arg1: i32, %arg2: memref<128x128xi8, #tpu.memory_space<vmem>>, %arg3: memref<128x128xbf16, #tpu.memory_space<vmem>>, %arg4: memref<128x128xbf16, #tpu.memory_space<vmem>>, %arg5: memref<128x128xbf16, #tpu.memory_space<vmem>>, %arg6: memref<1x128xf32, #tpu.memory_space<vmem>>, %arg7: memref<128x128xbf16, #tpu.memory_space<vmem>>, %arg8: memref<1x128xf32, #tpu.memory_space<vmem>>, %arg9: memref<1x1xf32, #tpu.memory_space<smem>>, %arg10: memref<128x128xbf16, #tpu.memory_space<vmem>>, %arg11: memref<128x128xf32, #tpu.memory_space<vmem>>) attributes {dimension_semantics = [#tpu.dimension_semantics<parallel>, #tpu.dimension_semantics<arbitrary>], iteration_bounds = array<i64: 1, 1>, scalar_prefetch = 0 : i64, scratch_operands = 1 : i64, tpu.core_type = #tpu.core_type<tc>, window_params = [{transform_indices = @transform_0, window_bounds = array<i64: 128, 128>}, {pipeline_mode = #tpu.pipeline_mode<synchronous>, transform_indices = @transform_1, window_bounds = array<i64: 128, 128>}, {transform_indices = @transform_2, window_bounds = array<i64: 128, 128>}, {pipeline_mode = #tpu.pipeline_mode<synchronous>, transform_indices = @transform_3, window_bounds = array<i64: 128, 128>}, {pipeline_mode = #tpu.pipeline_mode<synchronous>, transform_indices = @transform_4, window_bounds = array<i64: 1, 128>}, {pipeline_mode = #tpu.pipeline_mode<synchronous>, transform_indices = @transform_5, window_bounds = array<i64: 128, 128>}, {pipeline_mode = #tpu.pipeline_mode<synchronous>, transform_indices = @transform_6, window_bounds = array<i64: 1, 128>}, {transform_indices = @transform_7, window_bounds = array<i64: 1, 1>}, {transform_indices = @transform_8, window_bounds = array<i64: 128, 128>}]} {
    %c0_i32 = arith.constant 0 : i32
    %0 = arith.cmpi eq, %arg1, %c0_i32 : i32
    %1 = arith.extui %0 : i1 to i32
    %c0_i32_0 = arith.constant 0 : i32
    %2 = arith.cmpi ne, %1, %c0_i32_0 : i32
    scf.if %2 {
      %cst_9 = arith.constant 0.000000e+00 : f32
      %16 = vector.broadcast %cst_9 : f32 to vector<128x128xf32>
      %c0_10 = arith.constant 0 : index
      %c0_11 = arith.constant 0 : index
      %17 = vector.load %arg11[%c0_10, %c0_11] : memref<128x128xf32, #tpu.memory_space<vmem>>, vector<128x128xf32>
      tpu.vector_store %arg11[%c0_10, %c0_11], %16 {strides = array<i32>} : memref<128x128xf32, #tpu.memory_space<vmem>>, vector<128x128xf32>,
    } else {
    }
    %c0 = arith.constant 0 : index
    %c0_1 = arith.constant 0 : index
    %3 = vector.load %arg2[%c0, %c0_1] : memref<128x128xi8, #tpu.memory_space<vmem>>, vector<128x128xi8>
    %4 = arith.sitofp %3 : vector<128x128xi8> to vector<128x128xbf16>
    %c128_i32 = arith.constant 128 : i32
    %5 = arith.muli %arg1, %c128_i32 : i32
    %6 = tpu.assume_multiple %5, 128 : i32
    %7 = arith.index_cast %6 : i32 to index
    %c0_2 = arith.constant 0 : index
    %8 = vector.load %arg3[%7, %c0_2] : memref<128x128xbf16, #tpu.memory_space<vmem>>, vector<128x128xbf16>
    %c0_3 = arith.constant 0 : index
    %c0_4 = arith.constant 0 : index
    %9 = vector.load %arg11[%c0_3, %c0_4] : memref<128x128xf32, #tpu.memory_space<vmem>>, vector<128x128xf32>
    %cst = arith.constant dense<0.000000e+00> : vector<128x128xf32>
    %10 = tpu.matmul %4, %8, %cst {dimension_numbers = #tpu.dot_dimension_numbers<[1], [0], [0], [1], [0, 0, 1, 1], [], []>} : vector<128x128xbf16>, vector<128x128xbf16>, vector<128x128xf32> -> vector<128x128xf32>
    %11 = arith.addf %9, %10 : vector<128x128xf32>
    %c0_5 = arith.constant 0 : index
    %c0_6 = arith.constant 0 : index
    %12 = vector.load %arg11[%c0_5, %c0_6] : memref<128x128xf32, #tpu.memory_space<vmem>>, vector<128x128xf32>
    tpu.vector_store %arg11[%c0_5, %c0_6], %11 {strides = array<i32>} : memref<128x128xf32, #tpu.memory_space<vmem>>, vector<128x128xf32>,
    %c0_i32_7 = arith.constant 0 : i32
    %13 = arith.cmpi eq, %arg1, %c0_i32_7 : i32
    %14 = arith.extui %13 : i1 to i32
    %c0_i32_8 = arith.constant 0 : i32
    %15 = arith.cmpi ne, %14, %c0_i32_8 : i32
    scf.if %15 {
      %c0_9 = arith.constant 0 : index
      %c0_10 = arith.constant 0 : index
      %16 = memref.load %arg9[%c0_9, %c0_10] : memref<1x1xf32, #tpu.memory_space<smem>>
      %c0_11 = arith.constant 0 : index
      %c0_12 = arith.constant 0 : index
      %17 = vector.load %arg11[%c0_11, %c0_12] : memref<128x128xf32, #tpu.memory_space<vmem>>, vector<128x128xf32>
      %cst_13 = arith.constant 1.000000e+00 : f32
      %18 = arith.addf %cst_13, %16 : f32
      %c0_14 = arith.constant 0 : index
      %c0_15 = arith.constant 0 : index
      %19 = vector.load %arg4[%c0_14, %c0_15] : memref<128x128xbf16, #tpu.memory_space<vmem>>, vector<128x128xbf16>
      %20 = arith.extf %19 : vector<128x128xbf16> to vector<128x128xf32>
      %21 = vector.broadcast %18 : f32 to vector<128x128xf32>
      %22 = arith.mulf %21, %20 : vector<128x128xf32>
      %23 = arith.addf %17, %22 : vector<128x128xf32>
      %24 = arith.truncf %23 : vector<128x128xf32> to vector<128x128xbf16>
      %c0_16 = arith.constant 0 : index
      %c0_17 = arith.constant 0 : index
      %25 = vector.load %arg5[%c0_16, %c0_17] : memref<128x128xbf16, #tpu.memory_space<vmem>>, vector<128x128xbf16>
      %cst_18 = arith.constant dense<0.000000e+00> : vector<128x128xf32>
      %26 = tpu.matmul %24, %25, %cst_18 {dimension_numbers = #tpu.dot_dimension_numbers<[1], [0], [0], [1], [0, 0, 1, 1], [], []>} : vector<128x128xbf16>, vector<128x128xbf16>, vector<128x128xf32> -> vector<128x128xf32>
      %c0_19 = arith.constant 0 : index
      %c0_20 = arith.constant 0 : index
      %27 = vector.load %arg6[%c0_19, %c0_20] : memref<1x128xf32, #tpu.memory_space<vmem>>, vector<1x128xf32>
      %28 = vector.broadcast %27 : vector<1x128xf32> to vector<128x128xf32>
      %29 = arith.addf %26, %28 : vector<128x128xf32>
      %cst_21 = arith.constant 0.000000e+00 : f32
      %30 = vector.broadcast %cst_21 : f32 to vector<128x128xf32>
      %31 = arith.maximumf %29, %30 : vector<128x128xf32>
      %32 = arith.truncf %31 : vector<128x128xf32> to vector<128x128xbf16>
      %c0_22 = arith.constant 0 : index
      %c0_23 = arith.constant 0 : index
      %33 = vector.load %arg7[%c0_22, %c0_23] : memref<128x128xbf16, #tpu.memory_space<vmem>>, vector<128x128xbf16>
      %cst_24 = arith.constant dense<0.000000e+00> : vector<128x128xf32>
      %34 = tpu.matmul %32, %33, %cst_24 {dimension_numbers = #tpu.dot_dimension_numbers<[1], [0], [0], [1], [0, 0, 1, 1], [], []>} : vector<128x128xbf16>, vector<128x128xbf16>, vector<128x128xf32> -> vector<128x128xf32>
      %c0_25 = arith.constant 0 : index
      %c0_26 = arith.constant 0 : index
      %35 = vector.load %arg8[%c0_25, %c0_26] : memref<1x128xf32, #tpu.memory_space<vmem>>, vector<1x128xf32>
      %36 = vector.broadcast %35 : vector<1x128xf32> to vector<128x128xf32>
      %37 = arith.addf %34, %36 : vector<128x128xf32>
      %cst_27 = arith.constant 0.000000e+00 : f32
      %38 = vector.broadcast %cst_27 : f32 to vector<128x128xf32>
      %39 = arith.maximumf %37, %38 : vector<128x128xf32>
      %40 = arith.truncf %39 : vector<128x128xf32> to vector<128x128xbf16>
      %c0_28 = arith.constant 0 : index
      %c0_29 = arith.constant 0 : index
      %41 = vector.load %arg10[%c0_28, %c0_29] : memref<128x128xbf16, #tpu.memory_space<vmem>>, vector<128x128xbf16>
      tpu.vector_store %arg10[%c0_28, %c0_29], %40 {strides = array<i32>} : memref<128x128xbf16, #tpu.memory_space<vmem>>, vector<128x128xbf16>,
    } else {
    }
    return
  }
  func.func @transform_0(%arg0: i32, %arg1: i32) -> (i32, i32) {
    %c0_i32 = arith.constant 0 : i32
    return %arg0, %arg1 : i32, i32
  }
  func.func @transform_1(%arg0: i32, %arg1: i32) -> (i32, i32) {
    %c0_i32 = arith.constant 0 : i32
    %c0_i32_0 = arith.constant 0 : i32
    %c0_i32_1 = arith.constant 0 : i32
    return %c0_i32, %c0_i32_0 : i32, i32
  }
  func.func @transform_2(%arg0: i32, %arg1: i32) -> (i32, i32) {
    %c0_i32 = arith.constant 0 : i32
    %c0_i32_0 = arith.constant 0 : i32
    return %arg0, %c0_i32 : i32, i32
  }
  func.func @transform_3(%arg0: i32, %arg1: i32) -> (i32, i32) {
    %c0_i32 = arith.constant 0 : i32
    %c0_i32_0 = arith.constant 0 : i32
    %c0_i32_1 = arith.constant 0 : i32
    return %c0_i32, %c0_i32_0 : i32, i32
  }
  func.func @transform_4(%arg0: i32, %arg1: i32) -> (i32, i32) {
    %c0_i32 = arith.constant 0 : i32
    %c0_i32_0 = arith.constant 0 : i32
    %c0_i32_1 = arith.constant 0 : i32
    return %c0_i32, %c0_i32_0 : i32, i32
  }
  func.func @transform_5(%arg0: i32, %arg1: i32) -> (i32, i32) {
    %c0_i32 = arith.constant 0 : i32
    %c0_i32_0 = arith.constant 0 : i32
    %c0_i32_1 = arith.constant 0 : i32
    return %c0_i32, %c0_i32_0 : i32, i32
  }
  func.func @transform_6(%arg0: i32, %arg1: i32) -> (i32, i32) {
    %c0_i32 = arith.constant 0 : i32
    %c0_i32_0 = arith.constant 0 : i32
    %c0_i32_1 = arith.constant 0 : i32
    return %c0_i32, %c0_i32_0 : i32, i32
  }
  func.func @transform_7(%arg0: i32, %arg1: i32) -> (i32, i32) {
    %c0_i32 = arith.constant 0 : i32
    %c0_i32_0 = arith.constant 0 : i32
    %c0_i32_1 = arith.constant 0 : i32
    return %c0_i32, %c0_i32_0 : i32, i32
  }
  func.func @transform_8(%arg0: i32, %arg1: i32) -> (i32, i32) {
    %c0_i32 = arith.constant 0 : i32
    %c0_i32_0 = arith.constant 0 : i32
    return %arg0, %c0_i32 : i32, i32
  }
}

module attributes {stable_mosaic.version = 11 : i64} {
  func.func @readout_classifier_kernel(%arg0: i32, %arg1: memref<8x128xbf16, #tpu.memory_space<vmem>>, %arg2: memref<128x128xbf16, #tpu.memory_space<vmem>>, %arg3: memref<128x128xbf16, #tpu.memory_space<vmem>>, %arg4: memref<1x128xf32, #tpu.memory_space<vmem>>, %arg5: memref<128x128xbf16, #tpu.memory_space<vmem>>, %arg6: memref<1x128xf32, #tpu.memory_space<vmem>>, %arg7: memref<8x128xf32, #tpu.memory_space<vmem>>, %arg8: memref<8x128xf32, #tpu.memory_space<vmem>>) attributes {dimension_semantics = [#tpu.dimension_semantics<arbitrary>], iteration_bounds = array<i64: 1>, scalar_prefetch = 0 : i64, scratch_operands = 1 : i64, tpu.core_type = #tpu.core_type<tc>, window_params = [{transform_indices = @transform_0, window_bounds = array<i64: 8, 128>}, {transform_indices = @transform_1, window_bounds = array<i64: 128, 128>}, {pipeline_mode = #tpu.pipeline_mode<synchronous>, transform_indices = @transform_2, window_bounds = array<i64: 128, 128>}, {pipeline_mode = #tpu.pipeline_mode<synchronous>, transform_indices = @transform_3, window_bounds = array<i64: 1, 128>}, {pipeline_mode = #tpu.pipeline_mode<synchronous>, transform_indices = @transform_4, window_bounds = array<i64: 128, 128>}, {pipeline_mode = #tpu.pipeline_mode<synchronous>, transform_indices = @transform_5, window_bounds = array<i64: 1, 128>}, {pipeline_mode = #tpu.pipeline_mode<synchronous>, transform_indices = @transform_6, window_bounds = array<i64: 8, 128>}]} {
    %c0_i32 = arith.constant 0 : i32
    %0 = arith.cmpi eq, %arg0, %c0_i32 : i32
    %1 = arith.extui %0 : i1 to i32
    %c0_i32_0 = arith.constant 0 : i32
    %2 = arith.cmpi ne, %1, %c0_i32_0 : i32
    scf.if %2 {
      %cst_10 = arith.constant 0.000000e+00 : f32
      %12 = vector.broadcast %cst_10 : f32 to vector<8x128xf32>
      %c0_11 = arith.constant 0 : index
      %c0_12 = arith.constant 0 : index
      %13 = vector.load %arg8[%c0_11, %c0_12] : memref<8x128xf32, #tpu.memory_space<vmem>>, vector<8x128xf32>
      tpu.vector_store %arg8[%c0_11, %c0_12], %12 {strides = array<i32>} : memref<8x128xf32, #tpu.memory_space<vmem>>, vector<8x128xf32>,
    } else {
    }
    %c0 = arith.constant 0 : index
    %c0_1 = arith.constant 0 : index
    %3 = vector.load %arg8[%c0, %c0_1] : memref<8x128xf32, #tpu.memory_space<vmem>>, vector<8x128xf32>
    %c0_2 = arith.constant 0 : index
    %c0_3 = arith.constant 0 : index
    %4 = vector.load %arg1[%c0_2, %c0_3] : memref<8x128xbf16, #tpu.memory_space<vmem>>, vector<8x128xbf16>
    %c0_4 = arith.constant 0 : index
    %c0_5 = arith.constant 0 : index
    %5 = vector.load %arg2[%c0_4, %c0_5] : memref<128x128xbf16, #tpu.memory_space<vmem>>, vector<128x128xbf16>
    %cst = arith.constant dense<0.000000e+00> : vector<8x128xf32>
    %6 = tpu.matmul %4, %5, %cst {dimension_numbers = #tpu.dot_dimension_numbers<[1], [0], [0], [1], [0, 0, 1, 1], [], []>} : vector<8x128xbf16>, vector<128x128xbf16>, vector<8x128xf32> -> vector<8x128xf32>
    %7 = arith.addf %3, %6 : vector<8x128xf32>
    %c0_6 = arith.constant 0 : index
    %c0_7 = arith.constant 0 : index
    %8 = vector.load %arg8[%c0_6, %c0_7] : memref<8x128xf32, #tpu.memory_space<vmem>>, vector<8x128xf32>
    tpu.vector_store %arg8[%c0_6, %c0_7], %7 {strides = array<i32>} : memref<8x128xf32, #tpu.memory_space<vmem>>, vector<8x128xf32>,
    %c0_i32_8 = arith.constant 0 : i32
    %9 = arith.cmpi eq, %arg0, %c0_i32_8 : i32
    %10 = arith.extui %9 : i1 to i32
    %c0_i32_9 = arith.constant 0 : i32
    %11 = arith.cmpi ne, %10, %c0_i32_9 : i32
    scf.if %11 {
      %c0_10 = arith.constant 0 : index
      %c0_11 = arith.constant 0 : index
      %12 = vector.load %arg8[%c0_10, %c0_11] : memref<8x128xf32, #tpu.memory_space<vmem>>, vector<8x128xf32>
      %13 = arith.truncf %12 : vector<8x128xf32> to vector<8x128xbf16>
      %c0_12 = arith.constant 0 : index
      %c0_13 = arith.constant 0 : index
      %14 = vector.load %arg3[%c0_12, %c0_13] : memref<128x128xbf16, #tpu.memory_space<vmem>>, vector<128x128xbf16>
      %cst_14 = arith.constant dense<0.000000e+00> : vector<8x128xf32>
      %15 = tpu.matmul %13, %14, %cst_14 {dimension_numbers = #tpu.dot_dimension_numbers<[1], [0], [0], [1], [0, 0, 1, 1], [], []>} : vector<8x128xbf16>, vector<128x128xbf16>, vector<8x128xf32> -> vector<8x128xf32>
      %c0_15 = arith.constant 0 : index
      %c0_16 = arith.constant 0 : index
      %16 = vector.load %arg4[%c0_15, %c0_16] : memref<1x128xf32, #tpu.memory_space<vmem>>, vector<1x128xf32>
      %17 = vector.broadcast %16 : vector<1x128xf32> to vector<8x128xf32>
      %18 = arith.addf %15, %17 : vector<8x128xf32>
      %cst_17 = arith.constant 0.000000e+00 : f32
      %19 = vector.broadcast %cst_17 : f32 to vector<8x128xf32>
      %20 = arith.maximumf %18, %19 : vector<8x128xf32>
      %21 = arith.truncf %20 : vector<8x128xf32> to vector<8x128xbf16>
      %c0_18 = arith.constant 0 : index
      %c0_19 = arith.constant 0 : index
      %22 = vector.load %arg5[%c0_18, %c0_19] : memref<128x128xbf16, #tpu.memory_space<vmem>>, vector<128x128xbf16>
      %cst_20 = arith.constant dense<0.000000e+00> : vector<8x128xf32>
      %23 = tpu.matmul %21, %22, %cst_20 {dimension_numbers = #tpu.dot_dimension_numbers<[1], [0], [0], [1], [0, 0, 1, 1], [], []>} : vector<8x128xbf16>, vector<128x128xbf16>, vector<8x128xf32> -> vector<8x128xf32>
      %c0_21 = arith.constant 0 : index
      %c0_22 = arith.constant 0 : index
      %24 = vector.load %arg6[%c0_21, %c0_22] : memref<1x128xf32, #tpu.memory_space<vmem>>, vector<1x128xf32>
      %25 = vector.broadcast %24 : vector<1x128xf32> to vector<8x128xf32>
      %26 = arith.addf %23, %25 : vector<8x128xf32>
      %c0_23 = arith.constant 0 : index
      %c0_24 = arith.constant 0 : index
      %27 = vector.load %arg7[%c0_23, %c0_24] : memref<8x128xf32, #tpu.memory_space<vmem>>, vector<8x128xf32>
      tpu.vector_store %arg7[%c0_23, %c0_24], %26 {strides = array<i32>} : memref<8x128xf32, #tpu.memory_space<vmem>>, vector<8x128xf32>,
    } else {
    }
    return
  }
  func.func @transform_0(%arg0: i32) -> (i32, i32) {
    %c0_i32 = arith.constant 0 : i32
    %c0_i32_0 = arith.constant 0 : i32
    return %c0_i32, %arg0 : i32, i32
  }
  func.func @transform_1(%arg0: i32) -> (i32, i32) {
    %c0_i32 = arith.constant 0 : i32
    %c0_i32_0 = arith.constant 0 : i32
    return %arg0, %c0_i32 : i32, i32
  }
  func.func @transform_2(%arg0: i32) -> (i32, i32) {
    %c0_i32 = arith.constant 0 : i32
    %c0_i32_0 = arith.constant 0 : i32
    %c0_i32_1 = arith.constant 0 : i32
    return %c0_i32, %c0_i32_0 : i32, i32
  }
  func.func @transform_3(%arg0: i32) -> (i32, i32) {
    %c0_i32 = arith.constant 0 : i32
    %c0_i32_0 = arith.constant 0 : i32
    %c0_i32_1 = arith.constant 0 : i32
    return %c0_i32, %c0_i32_0 : i32, i32
  }
  func.func @transform_4(%arg0: i32) -> (i32, i32) {
    %c0_i32 = arith.constant 0 : i32
    %c0_i32_0 = arith.constant 0 : i32
    %c0_i32_1 = arith.constant 0 : i32
    return %c0_i32, %c0_i32_0 : i32, i32
  }
  func.func @transform_5(%arg0: i32) -> (i32, i32) {
    %c0_i32 = arith.constant 0 : i32
    %c0_i32_0 = arith.constant 0 : i32
    %c0_i32_1 = arith.constant 0 : i32
    return %c0_i32, %c0_i32_0 : i32, i32
  }
  func.func @transform_6(%arg0: i32) -> (i32, i32) {
    %c0_i32 = arith.constant 0 : i32
    %c0_i32_0 = arith.constant 0 : i32
    %c0_i32_1 = arith.constant 0 : i32
    return %c0_i32, %c0_i32_0 : i32, i32
  }
}

</mosaic_0001>

<bundles_post_ra>
// kernel: gnn_forward.7
= control target key start
LH: loop header
LB: loop body
LE: loop exit
PB: predicated region body
PF: predicated region fallthrough
CT: control target
= control target key end

     0   :  { %v510_v0 = vmov 0.0   ;;  %vm511_vm0 = vmmov 0   ;;  %s661_s1 = inlined_call_operand.vmem [shape: bf16[128,128], index: 1, kind: input, shape index: {}]   ;;  %s662_s2 = inlined_call_operand.vmem [shape: bf16[128,128], index: 2, kind: input, shape index: {}]   ;;  %s663_s0 = inlined_call_operand.vmem [shape: bf16[8,128], index: 0, kind: input, shape index: {}]   ;;  %s664_s4 = inlined_call_operand.vmem [shape: bf16[128,128], index: 4, kind: input, shape index: {}]   ;;  %s665_s3 = inlined_call_operand.vmem [shape: f32[1,128], index: 3, kind: input, shape index: {}]   ;;  %s666_s5 = inlined_call_operand.vmem [shape: f32[1,128], index: 5, kind: input, shape index: {}]   ;;  %s667_s6 = inlined_call_operand.vmem [shape: f32[8,128], index: 6, kind: output, shape index: {}]  }
   0x1   :  { %424 = vmatprep.subr.bf16.mxu0 %v510_v0  ;;  %v486_v1 = vld [vmem:[%s661_s1] sm:$0xff]   ;;  %440 = vmatprep.mubr.msk.bf16.mxu0 %vm511_vm0, %v510_v0  ;;  %v487_v2 = vld [vmem:[%s661_s1 + $0x8] sm:$0xff]   ;;  %v488_v3 = vld [vmem:[%s661_s1 + $0x10] sm:$0xff]  }
   0x2   :  { %444 = vmatprep.subr.bf16.mxu1 %v510_v0  ;;  %460 = vmatprep.mubr.msk.bf16.mxu1 %vm511_vm0, %v510_v0  ;;  %v494_v4 = vld [vmem:[%s662_s2] sm:$0xff]   ;;  %v489_v5 = vld [vmem:[%s661_s1 + $0x18] sm:$0xff]   ;;  %v495_v6 = vld [vmem:[%s662_s2 + $0x8] sm:$0xff]  }
   0x3   :  { %425 = vmatpush3.bf16.msra.mxu0 %v486_v1  ;;  %445 = vmatpush3.bf16.msra.mxu1 %v494_v4  ;;  %v490_v7 = vld [vmem:[%s661_s1 + $0x20] sm:$0xff]   ;;  %v496_v8 = vld [vmem:[%s662_s2 + $0x10] sm:$0xff]   ;;  %v491_v9 = vld [vmem:[%s661_s1 + $0x28] sm:$0xff]  }
   0x4   :  { %426 = vmatprep.subr.bf16.mxu0 %v510_v0  ;;  %446 = vmatprep.subr.bf16.mxu1 %v510_v0  ;;  %v497_v10 = vld [vmem:[%s662_s2 + $0x18] sm:$0xff]   ;;  %v492_v11 = vld [vmem:[%s661_s1 + $0x30] sm:$0xff]   ;;  %v498_v12 = vld [vmem:[%s662_s2 + $0x20] sm:$0xff]  }
   0x5   :  { %v493_v13 = vld [vmem:[%s661_s1 + $0x38] sm:$0xff]   ;;  %v499_v14 = vld [vmem:[%s662_s2 + $0x28] sm:$0xff]   ;;  %v30_v15 = vld [vmem:[%s663_s0] sm:$0xf] }
   0x6   :  { %v500_v16 = vld [vmem:[%s662_s2 + $0x30] sm:$0xff]   ;;  %v501_v17 = vld [vmem:[%s662_s2 + $0x38] sm:$0xff]   ;;  %v502_v18 = vld [vmem:[%s664_s4] sm:$0xff]  }
   0x7   :  { %427 = vmatpush3.bf16.msra.mxu0 %v487_v2  ;;  %447 = vmatpush3.bf16.msra.mxu1 %v495_v6  ;;  %v503_v19 = vld [vmem:[%s664_s4 + $0x8] sm:$0xff]   ;;  %v504_v20 = vld [vmem:[%s664_s4 + $0x10] sm:$0xff]   ;;  %v505_v21 = vld [vmem:[%s664_s4 + $0x18] sm:$0xff]  }
   0x8   :  { %428 = vmatprep.subr.bf16.mxu0 %v510_v0  ;;  %448 = vmatprep.subr.bf16.mxu1 %v510_v0  ;;  %v506_v22 = vld [vmem:[%s664_s4 + $0x20] sm:$0xff]   ;;  %v507_v23 = vld [vmem:[%s664_s4 + $0x28] sm:$0xff]   ;;  %v508_v29 = vld [vmem:[%s664_s4 + $0x30] sm:$0xff]  }
   0x9   :  { %v509_v30 = vld [vmem:[%s664_s4 + $0x38] sm:$0xff]   ;;  %v379_v31 = vld [vmem:[%s665_s3] ss:$0 sm:$0xff] }
   0xa   :  { %v388_v39 = vld [vmem:[%s666_s5] ss:$0 sm:$0xff] }
   0xb   :  { %429 = vmatpush3.bf16.msra.mxu0 %v488_v3  ;;  %449 = vmatpush3.bf16.msra.mxu1 %v496_v8 }
   0xc   :  { %430 = vmatprep.subr.bf16.mxu0 %v510_v0  ;;  %450 = vmatprep.subr.bf16.mxu1 %v510_v0 }
   0xf   :  { %431 = vmatpush3.bf16.msra.mxu0 %v489_v5  ;;  %451 = vmatpush3.bf16.msra.mxu1 %v497_v10 }
  0x10   :  { %432 = vmatprep.subr.bf16.mxu0 %v510_v0  ;;  %452 = vmatprep.subr.bf16.mxu1 %v510_v0 }
  0x13   :  { %433 = vmatpush3.bf16.msra.mxu0 %v490_v7  ;;  %453 = vmatpush3.bf16.msra.mxu1 %v498_v12 }
  0x14   :  { %434 = vmatprep.subr.bf16.mxu0 %v510_v0  ;;  %454 = vmatprep.subr.bf16.mxu1 %v510_v0 }
  0x17   :  { %435 = vmatpush3.bf16.msra.mxu0 %v491_v9  ;;  %455 = vmatpush3.bf16.msra.mxu1 %v499_v14 }
  0x18   :  { %436 = vmatprep.subr.bf16.mxu0 %v510_v0  ;;  %456 = vmatprep.subr.bf16.mxu1 %v510_v0 }
  0x1b   :  { %437 = vmatpush3.bf16.msra.mxu0 %v492_v11  ;;  %457 = vmatpush3.bf16.msra.mxu1 %v500_v16 }
  0x1c   :  { %438 = vmatprep.subr.bf16.mxu0 %v510_v0  ;;  %458 = vmatprep.subr.bf16.mxu1 %v510_v0 }
  0x1f   :  { %439 = vmatpush3.bf16.msra.mxu0 %v493_v13  ;;  %459 = vmatpush3.bf16.msra.mxu1 %v501_v17 }
  0x20   :  { %464 = vmatprep.subr.bf16.mxu0 %v510_v0 }
  0x22   :  { %441 = vmatmul.mubr.bf16.vlgmr.msra.gmra.mrb[0].mxu0 %v30_v15 }
  0x23   :  { %480 = vmatprep.mubr.msk.bf16.mxu0 %vm511_vm0, %v510_v0  ;;  %465 = vmatpush3.bf16.msra.mxu0 %v502_v18 }
  0x24   :  { %466 = vmatprep.subr.bf16.mxu0 %v510_v0 }
  0x27   :  { %467 = vmatpush3.bf16.msra.mxu0 %v503_v19 }
  0x28   :  { %468 = vmatprep.subr.bf16.mxu0 %v510_v0 }
  0x2b   :  { %469 = vmatpush3.bf16.msra.mxu0 %v504_v20 }
  0x2c   :  { %470 = vmatprep.subr.bf16.mxu0 %v510_v0 }
  0x2f   :  { %471 = vmatpush3.bf16.msra.mxu0 %v505_v21 }
  0x30   :  { %472 = vmatprep.subr.bf16.mxu0 %v510_v0 }
  0x33   :  { %473 = vmatpush3.bf16.msra.mxu0 %v506_v22 }
  0x34   :  { %474 = vmatprep.subr.bf16.mxu0 %v510_v0 }
  0x37   :  { %475 = vmatpush3.bf16.msra.mxu0 %v507_v23 }
  0x38   :  { %476 = vmatprep.subr.bf16.mxu0 %v510_v0 }
  0x3b   :  { %477 = vmatpush3.bf16.msra.mxu0 %v508_v29 }
  0x3c   :  { %478 = vmatprep.subr.bf16.mxu0 %v510_v0 }
  0x3f   :  { %479 = vmatpush3.bf16.msra.mxu0 %v509_v30 }
  0xf5   :  { %v129_v24 = vpop.f32.mrb[0].mxu0 }
  0xf6   :  { %v141_v25 = vpack.c.bf16 %v129_v24, %v129_v24  ;;  %v442_v26 = vpop.f32.mrb[1].mxu0 }
  0xf7   :  { %v132_v27 = vpop.f32.mrb[2].mxu0 }
  0xf8   :  { %v443_v28 = vpop.f32.mrb[3].mxu0  ;;  %461 = vmatmul.mubr.bf16.vlgmr.msra.gmra.mrb[0].mxu1 %v141_v25 }
 0x1cb   :  { %v247_v32 = vpop.f32.mrb[0].mxu1 }
 0x1cc   :  { %v248_v33 = vadd.f32 %v379_v31, %v247_v32  ;;  %v462_v34 = vpop.f32.mrb[1].mxu1 }
 0x1cd   :  { %v250_v35 = vpop.f32.mrb[2].mxu1 }
 0x1ce   :  { %v253_v36 = vmax.f32 %v248_v33, 0.0  ;;  %v463_v37 = vpop.f32.mrb[3].mxu1 }
 0x1d0   :  { %v254_v38 = vpack.c.bf16 %v253_v36, %v253_v36 }
 0x1d2   :  { %481 = vmatmul.mubr.bf16.vlgmr.msra.gmra.mrb[4].mxu0 %v254_v38 }
 0x2a5   :  { %v360_v40 = vpop.f32.mrb[4].mxu0 }
 0x2a6   :  { %v361_v41 = vadd.f32 %v388_v39, %v360_v40  ;;  %v482_v42 = vpop.f32.mrb[5].mxu0 }
 0x2a7   :  { %v363_v43 = vpop.f32.mrb[6].mxu0 }
 0x2a8   :  { %366 = vst [vmem:[%s667_s6] sm:$0xff] %v361_v41  ;;  %v483_v44 = vpop.f32.mrb[7].mxu0 }

// kernel: gnn_forward.4
= control target key start
LH: loop header
LB: loop body
LE: loop exit
PB: predicated region body
PF: predicated region fallthrough
CT: control target
= control target key end

     0   :  { %s1507_s1 = inlined_call_operand.vmem [shape: bf16[128,128], index: 1, kind: input, shape index: {}, may-alias: {1,2}]   ;;  %s1508_s0 = inlined_call_operand.vmem [shape: s8[128,128], index: 0, kind: input, shape index: {}]   ;;  %s1509_s3 = inlined_call_operand.vmem [shape: bf16[128,128], index: 3, kind: input, shape index: {}]   ;;  %s1510_s5 = inlined_call_operand.vmem [shape: bf16[128,128], index: 5, kind: input, shape index: {}]   ;;  %s1511_s2 = inlined_call_operand.vmem [shape: bf16[128,128], index: 2, kind: input, shape index: {}, may-alias: {1,2}]   ;;  %s1512_s7 = inlined_call_operand.<no memory space> [shape: f32[1,1], index: 7, kind: input, shape index: {}]   ;;  %s1513_s4 = inlined_call_operand.vmem [shape: f32[1,128], index: 4, kind: input, shape index: {}]   ;;  %s1514_s6 = inlined_call_operand.vmem [shape: f32[1,128], index: 6, kind: input, shape index: {}]   ;;  %s1515_s8 = inlined_call_operand.vmem [shape: bf16[128,128], index: 8, kind: output, shape index: {}]  }
   0x1   :  { %v1213_v0 = vld [vmem:[%s1507_s1] sm:$0xff]   ;;  %v1214_v1 = vld [vmem:[%s1507_s1 + $0x8] sm:$0xff]   ;;  %v1215_v2 = vld [vmem:[%s1507_s1 + $0x10] sm:$0xff]   ;;  %s365_s13 = sadd.f32 1.0, %s1512_s7 }
   0x2   :  { %1101 = vmatprep.subr.bf16.mxu0 %v1213_v0  ;;  %v1216_v3 = vld [vmem:[%s1507_s1 + $0x18] sm:$0xff]   ;;  %v51_v4 = vld [vmem:[%s1508_s0] sm:$0x3]  ;;  %v52_v5 = vld [vmem:[%s1508_s0 + $0x2] sm:$0x3] }
   0x3   :  { %1102 = vmatpush3.bf16.msra.mxu0 %v1213_v0  ;;  %v67_v6 = vunpack.c.l.s8.bf16 %v51_v4  ;;  %v68_v7 = vunpack.c.l.s8.bf16 %v52_v5  ;;  %v1217_v9 = vld [vmem:[%s1507_s1 + $0x20] sm:$0xff]   ;;  %v1222_v11 = vld [vmem:[%s1509_s3 + $0x8] sm:$0xff]   ;;  %v1223_v13 = vld [vmem:[%s1509_s3 + $0x10] sm:$0xff]  }
   0x4   :  { %1103 = vmatprep.subr.bf16.mxu0 %v1214_v1  ;;  %v1221_v10 = vld [vmem:[%s1509_s3] sm:$0xff]   ;;  %v1218_v12 = vld [vmem:[%s1507_s1 + $0x28] sm:$0xff]   ;;  %v1219_v14 = vld [vmem:[%s1507_s1 + $0x30] sm:$0xff]  }
   0x5   :  { %v901_v8 = vcombine.low %v67_v6, %v68_v7  ;;  %1133 = vmatprep.subr.bf16.mxu1 %v1221_v10  ;;  %v1224_v15 = vld [vmem:[%s1509_s3 + $0x18] sm:$0xff]   ;;  %v53_v16 = vld [vmem:[%s1508_s0 + $0x4] sm:$0x3]  ;;  %v54_v17 = vld [vmem:[%s1508_s0 + $0x6] sm:$0x3] }
   0x6   :  { %1134 = vmatpush3.bf16.msra.mxu1 %v1221_v10  ;;  %v1220_v18 = vld [vmem:[%s1507_s1 + $0x38] sm:$0xff]   ;;  %v55_v19 = vld [vmem:[%s1508_s0 + $0x8] sm:$0x3]  ;;  %v56_v20 = vld [vmem:[%s1508_s0 + $0xa] sm:$0x3]  ;;  %v69_v21 = vunpack.c.l.s8.bf16 %v53_v16  ;;  %v70_v22 = vunpack.c.l.s8.bf16 %v54_v17 }
   0x7   :  { %1104 = vmatpush3.bf16.msra.mxu0 %v1214_v1  ;;  %1117 = vmatprep.mubr.bf16.mxu0 %v901_v8  ;;  %v1225_v23 = vld [vmem:[%s1509_s3 + $0x20] sm:$0xff]   ;;  %v71_v24 = vunpack.c.l.s8.bf16 %v55_v19  ;;  %v72_v25 = vunpack.c.l.s8.bf16 %v56_v20  ;;  %v1226_v27 = vld [vmem:[%s1509_s3 + $0x28] sm:$0xff]   ;;  %v59_v31 = vld [vmem:[%s1508_s0 + $0x10] sm:$0x3] }
   0x8   :  { %1105 = vmatprep.subr.bf16.mxu0 %v1215_v2  ;;  %1135 = vmatprep.subr.bf16.mxu1 %v1222_v11  ;;  %v902_v26 = vcombine.low %v69_v21, %v70_v22  ;;  %v57_v29 = vld [vmem:[%s1508_s0 + $0xc] sm:$0x3]  ;;  %v58_v30 = vld [vmem:[%s1508_s0 + $0xe] sm:$0x3]  ;;  %v60_v32 = vld [vmem:[%s1508_s0 + $0x12] sm:$0x3]  ;;  %v75_v35 = vunpack.c.l.s8.bf16 %v59_v31 }
   0x9   :  { %v903_v28 = vcombine.low %v71_v24, %v72_v25  ;;  %v73_v33 = vunpack.c.l.s8.bf16 %v57_v29  ;;  %v74_v34 = vunpack.c.l.s8.bf16 %v58_v30  ;;  %v76_v36 = vunpack.c.l.s8.bf16 %v60_v32  ;;  %v61_v39 = vld [vmem:[%s1508_s0 + $0x14] sm:$0x3]  ;;  %v62_v40 = vld [vmem:[%s1508_s0 + $0x16] sm:$0x3]  ;;  %v63_v41 = vld [vmem:[%s1508_s0 + $0x18] sm:$0x3] }
   0xa   :  { %1136 = vmatpush3.bf16.msra.mxu1 %v1222_v11  ;;  %v64_v42 = vld [vmem:[%s1508_s0 + $0x1a] sm:$0x3]  ;;  %v77_v43 = vunpack.c.l.s8.bf16 %v61_v39  ;;  %v78_v44 = vunpack.c.l.s8.bf16 %v62_v40  ;;  %v79_v45 = vunpack.c.l.s8.bf16 %v63_v41  ;;  %v65_v49 = vld [vmem:[%s1508_s0 + $0x1c] sm:$0x3]  ;;  %v66_v50 = vld [vmem:[%s1508_s0 + $0x1e] sm:$0x3] }
   0xb   :  { %1106 = vmatpush3.bf16.msra.mxu0 %v1215_v2  ;;  %1137 = vmatprep.subr.bf16.mxu1 %v1223_v13  ;;  %v904_v37 = vcombine.low %v73_v33, %v74_v34  ;;  %v905_v38 = vcombine.low %v75_v35, %v76_v36  ;;  %v80_v46 = vunpack.c.l.s8.bf16 %v64_v42  ;;  %v81_v51 = vunpack.c.l.s8.bf16 %v65_v49  ;;  %v1227_v54 = vld [vmem:[%s1509_s3 + $0x30] sm:$0xff]   ;;  %v1228_v55 = vld [vmem:[%s1509_s3 + $0x38] sm:$0xff]   ;;  %v1229_v56 = vld [vmem:[%s1510_s5] sm:$0xff]  }
   0xc   :  { %1107 = vmatprep.subr.bf16.mxu0 %v1216_v3  ;;  %v906_v47 = vcombine.low %v77_v43, %v78_v44  ;;  %v82_v52 = vunpack.c.l.s8.bf16 %v66_v50  ;;  %v1384_v57 = vld [vmem:[%s1510_s5 + $0x8] sm:$0xff]   ;;  %v1390_v58 = vld [vmem:[%s1510_s5 + $0x10] sm:$0xff]   ;;  %v1397_v59 = vld [vmem:[%s1510_s5 + $0x18] sm:$0xff]   ;;  %v1425_v2 = vstv %s365_s13 }
   0xd   :  { %v907_v48 = vcombine.low %v79_v45, %v80_v46  ;;  %v1404_v60 = vld [vmem:[%s1510_s5 + $0x20] sm:$0xff]   ;;  %v1411_v61 = vld [vmem:[%s1510_s5 + $0x28] sm:$0xff]   ;;  %v1041_v10 = vld [vmem:[%s1511_s2 + $0x18] sm:$0xff]  }
   0xe   :  { %1138 = vmatpush3.bf16.msra.mxu1 %v1223_v13  ;;  %v908_v53 = vcombine.low %v81_v51, %v82_v52  ;;  %v1039_v62 = vld [vmem:[%s1511_s2 + $0x8] sm:$0xff]   ;;  %v968_v63 = vld [vmem:[%s1511_s2] sm:$0xff]   ;;  %v981_v17 = vunpack.c.l.bf16 %v1041_v10  ;;  %v1045_v50 = vld [vmem:[%s1511_s2 + $0x38] sm:$0xff]  }
   0xf   :  { %1108 = vmatpush3.bf16.msra.mxu0 %v1216_v3  ;;  %1139 = vmatprep.subr.bf16.mxu1 %v1224_v15  ;;  %v973_v0 = vunpack.c.l.bf16 %v1039_v62  ;;  %v974_v1 = vunpack.c.h.bf16 %v1039_v62  ;;  %v969_v3 = vunpack.c.l.bf16 %v968_v63  ;;  %v970_v4 = vunpack.c.h.bf16 %v968_v63  ;;  %v1043_v30 = vld [vmem:[%s1511_s2 + $0x28] sm:$0xff]   ;;  %v1042_v32 = vld [vmem:[%s1511_s2 + $0x20] sm:$0xff]   ;;  %v1044_v52 = vld [vmem:[%s1511_s2 + $0x30] sm:$0xff]  }
  0x10   :  { %1109 = vmatprep.subr.bf16.mxu0 %v1217_v9  ;;  %v405_v25 = vmul.f32 %v981_v17, %v1425_v2  ;;  %v985_v41 = vunpack.c.l.bf16 %v1042_v32  ;;  %v986_v42 = vunpack.c.h.bf16 %v1042_v32  ;;  %v998_v62 = vunpack.c.h.bf16 %v1045_v50 }
  0x11   :  { %v401_v5 = vmul.f32 %v973_v0, %v1425_v2  ;;  %v402_v6 = vmul.f32 %v974_v1, %v1425_v2  ;;  %v399_v8 = vmul.f32 %v969_v3, %v1425_v2  ;;  %v993_v1 = vunpack.c.l.bf16 %v1044_v52 }
  0x12   :  { %1140 = vmatpush3.bf16.msra.mxu1 %v1224_v15  ;;  %v408_v49 = vmul.f32 %v986_v42, %v1425_v2  ;;  %v994_v3 = vunpack.c.h.bf16 %v1044_v52 }
  0x13   :  { %1110 = vmatpush3.bf16.msra.mxu0 %v1217_v9  ;;  %1141 = vmatprep.subr.bf16.mxu1 %v1225_v23  ;;  %v400_v9 = vmul.f32 %v970_v4, %v1425_v2 }
  0x14   :  { %1111 = vmatprep.subr.bf16.mxu0 %v1218_v12 }
  0x16   :  { %1142 = vmatpush3.bf16.msra.mxu1 %v1225_v23 }
  0x17   :  { %1112 = vmatpush3.bf16.msra.mxu0 %v1218_v12  ;;  %1143 = vmatprep.subr.bf16.mxu1 %v1226_v27  ;;  %v1040_v12 = vld [vmem:[%s1511_s2 + $0x10] sm:$0xff]  }
  0x18   :  { %1113 = vmatprep.subr.bf16.mxu0 %v1219_v14  ;;  %v977_v21 = vunpack.c.l.bf16 %v1040_v12  ;;  %v978_v22 = vunpack.c.h.bf16 %v1040_v12 }
  0x1a   :  { %1144 = vmatpush3.bf16.msra.mxu1 %v1226_v27  ;;  %v404_v29 = vmul.f32 %v978_v22, %v1425_v2 }
  0x1b   :  { %1114 = vmatpush3.bf16.msra.mxu0 %v1219_v14  ;;  %1145 = vmatprep.subr.bf16.mxu1 %v1227_v54 }
  0x1c   :  { %1115 = vmatprep.subr.bf16.mxu0 %v1220_v18 }
  0x1e   :  { %1146 = vmatpush3.bf16.msra.mxu1 %v1227_v54 }
  0x1f   :  { %1116 = vmatpush3.bf16.msra.mxu0 %v1220_v18  ;;  %1147 = vmatprep.subr.bf16.mxu1 %v1228_v55  ;;  %v982_v18 = vunpack.c.h.bf16 %v1041_v10 }
  0x20   :  { %1165 = vmatprep.subr.bf16.mxu0 %v1229_v56 }
  0x22   :  { %1118 = vmatmul.mubr.bf16.vlgmr.msra.gmra.mrb[0].mxu0 %v902_v26  ;;  %1148 = vmatpush3.bf16.msra.mxu1 %v1228_v55  ;;  %v406_v26 = vmul.f32 %v982_v18, %v1425_v2 }
  0x23   :  { %1121 = vmatprep.mubr.bf16.mxu0 %v903_v28  ;;  %1197 = vmatprep.subr.bf16.mxu1 %v1229_v56  ;;  %v403_v28 = vmul.f32 %v977_v21, %v1425_v2 }
  0x24   :  { %1166 = vmatpush3.bf16.msra.mxu0 %v1229_v56 }
  0x25   :  { %1167 = vmatprep.subr.bf16.mxu0 %v1384_v57 }
  0x28   :  { %1168 = vmatpush3.bf16.msra.mxu0 %v1384_v57 }
  0x29   :  { %1169 = vmatprep.subr.bf16.mxu0 %v1390_v58 }
  0x2a   :  { %1122 = vmatmul.mubr.bf16.gmra.mrb[4].mxu0 %v904_v37  ;;  %v989_v37 = vunpack.c.l.bf16 %v1043_v30 }
  0x2b   :  { %1125 = vmatprep.mubr.bf16.mxu0 %v905_v38  ;;  %v990_v38 = vunpack.c.h.bf16 %v1043_v30 }
  0x2c   :  { %1170 = vmatpush3.bf16.msra.mxu0 %v1390_v58  ;;  %v409_v45 = vmul.f32 %v989_v37, %v1425_v2 }
  0x2d   :  { %1171 = vmatprep.subr.bf16.mxu0 %v1397_v59  ;;  %v410_v46 = vmul.f32 %v990_v38, %v1425_v2 }
  0x30   :  { %1172 = vmatpush3.bf16.msra.mxu0 %v1397_v59 }
  0x31   :  { %1173 = vmatprep.subr.bf16.mxu0 %v1404_v60 }
  0x32   :  { %1126 = vmatmul.mubr.bf16.gmra.mrb[8].mxu0 %v906_v47 }
  0x33   :  { %1129 = vmatprep.mubr.bf16.mxu0 %v907_v48  ;;  %v407_v48 = vmul.f32 %v985_v41, %v1425_v2 }
  0x34   :  { %1174 = vmatpush3.bf16.msra.mxu0 %v1404_v60 }
  0x35   :  { %1175 = vmatprep.subr.bf16.mxu0 %v1411_v61 }
  0x38   :  { %1176 = vmatpush3.bf16.msra.mxu0 %v1411_v61 }
  0x3a   :  { %1130 = vmatmul.mubr.bf16.gmra.mrb[12].mxu0 %v908_v53 }
  0xf5   :  { %v1119_v7 = vpop.f32.mrb[0].mxu0 }
  0xf6   :  { %v250_v11 = vpop.f32.mrb[1].mxu0  ;;  %v417_v14 = vadd.f32 %v1119_v7, %v401_v5  ;;  %v414_v7 = vmul.f32 %v998_v62, %v1425_v2 }
  0xf7   :  { %v1120_v13 = vpop.f32.mrb[2].mxu0  ;;  %v415_v19 = vadd.f32 %v399_v8, %v250_v11  ;;  %v411_v8 = vmul.f32 %v993_v1, %v1425_v2 }
  0xf8   :  { %v418_v15 = vadd.f32 %v1120_v13, %v402_v6  ;;  %v253_v16 = vpop.f32.mrb[3].mxu0 }
  0xf9   :  { %v416_v20 = vadd.f32 %v400_v9, %v253_v16  ;;  %v412_v9 = vmul.f32 %v994_v3, %v1425_v2 }
  0xfa   :  { %v432_v23 = vpack.c.bf16 %v418_v15, %v417_v14 }
  0xfb   :  { %v431_v24 = vpack.c.bf16 %v416_v20, %v415_v19 }
  0xfd   :  { %v1123_v27 = vpop.f32.mrb[4].mxu0  ;;  %1149 = vmatprep.mubr.bf16.mxu1 %v431_v24 }
  0xfe   :  { %v266_v31 = vpop.f32.mrb[5].mxu0  ;;  %1150 = vmatmul.mubr.bf16.vlgmr.msra.gmra.mrb[0].mxu1 %v432_v23  ;;  %v421_v34 = vadd.f32 %v1123_v27, %v405_v25 }
  0xff   :  { %v1124_v33 = vpop.f32.mrb[6].mxu0  ;;  %1205 = vmatpush3.bf16.msra.mxu1 %v1229_v56  ;;  %v419_v39 = vadd.f32 %v403_v28, %v266_v31 }
 0x100   :  { %v422_v35 = vadd.f32 %v1124_v33, %v406_v26  ;;  %v269_v36 = vpop.f32.mrb[7].mxu0  ;;  %1198 = vmatprep.subr.bf16.mxu1 %v1384_v57 }
 0x101   :  { %v420_v40 = vadd.f32 %v404_v29, %v269_v36 }
 0x102   :  { %v434_v43 = vpack.c.bf16 %v422_v35, %v421_v34 }
 0x103   :  { %v433_v44 = vpack.c.bf16 %v420_v40, %v419_v39  ;;  %1206 = vmatpush3.bf16.msra.mxu1 %v1384_v57  ;;  %v997_v57 = vunpack.c.l.bf16 %v1045_v50 }
 0x104   :  { %1199 = vmatprep.subr.bf16.mxu1 %v1390_v58 }
 0x105   :  { %v1127_v47 = vpop.f32.mrb[8].mxu0  ;;  %1153 = vmatprep.mubr.bf16.mxu1 %v433_v44  ;;  %v413_v6 = vmul.f32 %v997_v57, %v1425_v2  ;;  %v1235_v2 = vld [vmem:[%s1510_s5 + $0x30] sm:$0xff]  }
 0x106   :  { %v282_v51 = vpop.f32.mrb[9].mxu0  ;;  %1154 = vmatmul.mubr.bf16.gmra.mrb[4].mxu1 %v434_v43  ;;  %v425_v54 = vadd.f32 %v1127_v47, %v409_v45  ;;  %1177 = vmatprep.subr.bf16.mxu0 %v1235_v2 }
 0x107   :  { %v1128_v53 = vpop.f32.mrb[10].mxu0  ;;  %1207 = vmatpush3.bf16.msra.mxu1 %v1390_v58  ;;  %v423_v63 = vadd.f32 %v407_v48, %v282_v51  ;;  %1178 = vmatpush3.bf16.msra.mxu0 %v1235_v2 }
 0x108   :  { %v426_v55 = vadd.f32 %v1128_v53, %v410_v46  ;;  %v285_v56 = vpop.f32.mrb[11].mxu0  ;;  %1200 = vmatprep.subr.bf16.mxu1 %v1397_v59 }
 0x109   :  { %v424_v0 = vadd.f32 %v408_v49, %v285_v56 }
 0x10a   :  { %v436_v4 = vpack.c.bf16 %v426_v55, %v425_v54 }
 0x10b   :  { %v435_v5 = vpack.c.bf16 %v424_v0, %v423_v63  ;;  %1208 = vmatpush3.bf16.msra.mxu1 %v1397_v59 }
 0x10c   :  { %1201 = vmatprep.subr.bf16.mxu1 %v1404_v60 }
 0x10d   :  { %v1131_v58 = vpop.f32.mrb[12].mxu0  ;;  %1157 = vmatprep.mubr.bf16.mxu1 %v435_v5 }
 0x10e   :  { %v298_v10 = vpop.f32.mrb[13].mxu0  ;;  %1158 = vmatmul.mubr.bf16.gmra.mrb[8].mxu1 %v436_v4  ;;  %v429_v12 = vadd.f32 %v1131_v58, %v413_v6 }
 0x10f   :  { %v1132_v11 = vpop.f32.mrb[14].mxu0  ;;  %1209 = vmatpush3.bf16.msra.mxu1 %v1404_v60  ;;  %v427_v14 = vadd.f32 %v411_v8, %v298_v10  ;;  %v1236_v60 = vld [vmem:[%s1510_s5 + $0x38] sm:$0xff]  }
 0x110   :  { %v430_v13 = vadd.f32 %v1132_v11, %v414_v7  ;;  %v301_v59 = vpop.f32.mrb[15].mxu0  ;;  %1202 = vmatprep.subr.bf16.mxu1 %v1411_v61  ;;  %1179 = vmatprep.subr.bf16.mxu0 %v1236_v60 }
 0x111   :  { %v428_v15 = vadd.f32 %v412_v9, %v301_v59  ;;  %1180 = vmatpush3.bf16.msra.mxu0 %v1236_v60  ;;  %v926_v59 = vld [vmem:[%s1514_s6] ss:$0 sm:$0xff] }
 0x112   :  { %v438_v16 = vpack.c.bf16 %v430_v13, %v429_v12 }
 0x113   :  { %v437_v17 = vpack.c.bf16 %v428_v15, %v427_v14  ;;  %1210 = vmatpush3.bf16.msra.mxu1 %v1411_v61  ;;  %v917_v61 = vld [vmem:[%s1513_s4] ss:$0 sm:$0xff] }
 0x114   :  { %1203 = vmatprep.subr.bf16.mxu1 %v1235_v2 }
 0x115   :  { %1161 = vmatprep.mubr.bf16.mxu1 %v437_v17 }
 0x116   :  { %1162 = vmatmul.mubr.bf16.gmra.mrb[12].mxu1 %v438_v16 }
 0x117   :  { %1211 = vmatpush3.bf16.msra.mxu1 %v1235_v2 }
 0x118   :  { %1204 = vmatprep.subr.bf16.mxu1 %v1236_v60 }
 0x11b   :  { %1212 = vmatpush3.bf16.msra.mxu1 %v1236_v60 }
 0x1d1   :  { %v1151_v18 = vpop.f32.mrb[0].mxu1 }
 0x1d2   :  { %v553_v19 = vadd.f32 %v1151_v18, %v917_v61  ;;  %v544_v20 = vpop.f32.mrb[1].mxu1 }
 0x1d3   :  { %v545_v21 = vadd.f32 %v917_v61, %v544_v20  ;;  %v1152_v22 = vpop.f32.mrb[2].mxu1 }
 0x1d4   :  { %v556_v23 = vadd.f32 %v1152_v22, %v917_v61  ;;  %v547_v24 = vpop.f32.mrb[3].mxu1  ;;  %v609_v26 = vmax.f32 %v553_v19, 0.0 }
 0x1d5   :  { %v548_v25 = vadd.f32 %v917_v61, %v547_v24  ;;  %v607_v28 = vmax.f32 %v545_v21, 0.0 }
 0x1d6   :  { %v610_v27 = vmax.f32 %v556_v23, 0.0 }
 0x1d7   :  { %v608_v29 = vmax.f32 %v548_v25, 0.0 }
 0x1d8   :  { %v624_v30 = vpack.c.bf16 %v610_v27, %v609_v26 }
 0x1d9   :  { %v623_v31 = vpack.c.bf16 %v608_v29, %v607_v28  ;;  %v1155_v32 = vpop.f32.mrb[4].mxu1 }
 0x1da   :  { %v569_v33 = vadd.f32 %v1155_v32, %v917_v61  ;;  %v560_v34 = vpop.f32.mrb[5].mxu1 }
 0x1db   :  { %v561_v35 = vadd.f32 %v917_v61, %v560_v34  ;;  %v1156_v36 = vpop.f32.mrb[6].mxu1  ;;  %1181 = vmatprep.mubr.bf16.mxu0 %v623_v31 }
 0x1dc   :  { %v572_v37 = vadd.f32 %v1156_v36, %v917_v61  ;;  %v563_v38 = vpop.f32.mrb[7].mxu1  ;;  %1182 = vmatmul.mubr.bf16.vlgmr.msra.gmra.mrb[16].mxu0 %v624_v30  ;;  %v613_v40 = vmax.f32 %v569_v33, 0.0 }
 0x1dd   :  { %v564_v39 = vadd.f32 %v917_v61, %v563_v38  ;;  %v611_v42 = vmax.f32 %v561_v35, 0.0 }
 0x1de   :  { %v614_v41 = vmax.f32 %v572_v37, 0.0 }
 0x1df   :  { %v612_v43 = vmax.f32 %v564_v39, 0.0 }
 0x1e0   :  { %v626_v44 = vpack.c.bf16 %v614_v41, %v613_v40 }
 0x1e1   :  { %v625_v45 = vpack.c.bf16 %v612_v43, %v611_v42  ;;  %v1159_v46 = vpop.f32.mrb[8].mxu1 }
 0x1e2   :  { %v585_v47 = vadd.f32 %v1159_v46, %v917_v61  ;;  %v576_v48 = vpop.f32.mrb[9].mxu1 }
 0x1e3   :  { %v577_v49 = vadd.f32 %v917_v61, %v576_v48  ;;  %v1160_v50 = vpop.f32.mrb[10].mxu1  ;;  %1185 = vmatprep.mubr.bf16.mxu0 %v625_v45 }
 0x1e4   :  { %v588_v51 = vadd.f32 %v1160_v50, %v917_v61  ;;  %v579_v52 = vpop.f32.mrb[11].mxu1  ;;  %1186 = vmatmul.mubr.bf16.gmra.mrb[20].mxu0 %v626_v44  ;;  %v617_v54 = vmax.f32 %v585_v47, 0.0 }
 0x1e5   :  { %v580_v53 = vadd.f32 %v917_v61, %v579_v52  ;;  %v615_v56 = vmax.f32 %v577_v49, 0.0 }
 0x1e6   :  { %v618_v55 = vmax.f32 %v588_v51, 0.0 }
 0x1e7   :  { %v616_v57 = vmax.f32 %v580_v53, 0.0 }
 0x1e8   :  { %v628_v62 = vpack.c.bf16 %v618_v55, %v617_v54 }
 0x1e9   :  { %v627_v63 = vpack.c.bf16 %v616_v57, %v615_v56  ;;  %v1163_v0 = vpop.f32.mrb[12].mxu1 }
 0x1ea   :  { %v601_v1 = vadd.f32 %v1163_v0, %v917_v61  ;;  %v592_v3 = vpop.f32.mrb[13].mxu1 }
 0x1eb   :  { %v593_v4 = vadd.f32 %v917_v61, %v592_v3  ;;  %v1164_v5 = vpop.f32.mrb[14].mxu1  ;;  %1189 = vmatprep.mubr.bf16.mxu1 %v627_v63 }
 0x1ec   :  { %v604_v6 = vadd.f32 %v1164_v5, %v917_v61  ;;  %v595_v7 = vpop.f32.mrb[15].mxu1  ;;  %1190 = vmatmul.mubr.bf16.vlgmr.msra.gmra.mrb[16].mxu1 %v628_v62  ;;  %v621_v8 = vmax.f32 %v601_v1, 0.0 }
 0x1ed   :  { %v596_v58 = vadd.f32 %v917_v61, %v595_v7  ;;  %v619_v10 = vmax.f32 %v593_v4, 0.0 }
 0x1ee   :  { %v622_v9 = vmax.f32 %v604_v6, 0.0 }
 0x1ef   :  { %v620_v11 = vmax.f32 %v596_v58, 0.0 }
 0x1f0   :  { %v630_v12 = vpack.c.bf16 %v622_v9, %v621_v8 }
 0x1f1   :  { %v629_v13 = vpack.c.bf16 %v620_v11, %v619_v10 }
 0x1f3   :  { %1193 = vmatprep.mubr.bf16.mxu1 %v629_v13 }
 0x1f4   :  { %1194 = vmatmul.mubr.bf16.gmra.mrb[20].mxu1 %v630_v12 }
 0x2af   :  { %v1183_v14 = vpop.f32.mrb[16].mxu0 }
 0x2b0   :  { %v745_v15 = vadd.f32 %v1183_v14, %v926_v59  ;;  %v736_v16 = vpop.f32.mrb[17].mxu0 }
 0x2b1   :  { %v737_v17 = vadd.f32 %v926_v59, %v736_v16  ;;  %v1184_v2 = vpop.f32.mrb[18].mxu0 }
 0x2b2   :  { %v748_v60 = vadd.f32 %v1184_v2, %v926_v59  ;;  %v739_v18 = vpop.f32.mrb[19].mxu0  ;;  %v801_v19 = vmax.f32 %v745_v15, 0.0 }
 0x2b3   :  { %v740_v61 = vadd.f32 %v926_v59, %v739_v18  ;;  %v799_v21 = vmax.f32 %v737_v17, 0.0 }
 0x2b4   :  { %v802_v20 = vmax.f32 %v748_v60, 0.0 }
 0x2b5   :  { %v800_v22 = vmax.f32 %v740_v61, 0.0 }
 0x2b6   :  { %v1007_v23 = vpack.c.bf16 %v802_v20, %v801_v19 }
 0x2b7   :  { %v1002_v24 = vpack.c.bf16 %v800_v22, %v799_v21  ;;  %v1187_v25 = vpop.f32.mrb[20].mxu0 }
 0x2b8   :  { %1046 = vst [vmem:[%s1515_s8 + $0x8] sm:$0xff] %v1007_v23   ;;  %v761_v26 = vadd.f32 %v1187_v25, %v926_v59  ;;  %v752_v27 = vpop.f32.mrb[21].mxu0 }
 0x2b9   :  { %1003 = vst [vmem:[%s1515_s8] sm:$0xff] %v1002_v24   ;;  %v753_v28 = vadd.f32 %v926_v59, %v752_v27  ;;  %v1188_v29 = vpop.f32.mrb[22].mxu0 }
 0x2ba   :  { %v764_v30 = vadd.f32 %v1188_v29, %v926_v59  ;;  %v755_v31 = vpop.f32.mrb[23].mxu0  ;;  %v805_v33 = vmax.f32 %v761_v26, 0.0 }
 0x2bb   :  { %v756_v32 = vadd.f32 %v926_v59, %v755_v31  ;;  %v803_v35 = vmax.f32 %v753_v28, 0.0 }
 0x2bc   :  { %v806_v34 = vmax.f32 %v764_v30, 0.0 }
 0x2bd   :  { %v804_v36 = vmax.f32 %v756_v32, 0.0 }
 0x2be   :  { %v1017_v37 = vpack.c.bf16 %v806_v34, %v805_v33 }
 0x2bf   :  { %v1012_v38 = vpack.c.bf16 %v804_v36, %v803_v35  ;;  %v1191_v39 = vpop.f32.mrb[16].mxu1 }
 0x2c0   :  { %1048 = vst [vmem:[%s1515_s8 + $0x18] sm:$0xff] %v1017_v37   ;;  %v777_v40 = vadd.f32 %v1191_v39, %v926_v59  ;;  %v768_v41 = vpop.f32.mrb[17].mxu1 }
 0x2c1   :  { %1047 = vst [vmem:[%s1515_s8 + $0x10] sm:$0xff] %v1012_v38   ;;  %v769_v42 = vadd.f32 %v926_v59, %v768_v41  ;;  %v1192_v43 = vpop.f32.mrb[18].mxu1 }
 0x2c2   :  { %v780_v44 = vadd.f32 %v1192_v43, %v926_v59  ;;  %v771_v45 = vpop.f32.mrb[19].mxu1  ;;  %v809_v47 = vmax.f32 %v777_v40, 0.0 }
 0x2c3   :  { %v772_v46 = vadd.f32 %v926_v59, %v771_v45  ;;  %v807_v49 = vmax.f32 %v769_v42, 0.0 }
 0x2c4   :  { %v810_v48 = vmax.f32 %v780_v44, 0.0 }
 0x2c5   :  { %v808_v50 = vmax.f32 %v772_v46, 0.0 }
 0x2c6   :  { %v1027_v51 = vpack.c.bf16 %v810_v48, %v809_v47 }
 0x2c7   :  { %v1022_v52 = vpack.c.bf16 %v808_v50, %v807_v49  ;;  %v1195_v53 = vpop.f32.mrb[20].mxu1 }
 0x2c8   :  { %1050 = vst [vmem:[%s1515_s8 + $0x28] sm:$0xff] %v1027_v51   ;;  %v793_v54 = vadd.f32 %v1195_v53, %v926_v59  ;;  %v784_v55 = vpop.f32.mrb[21].mxu1 }
 0x2c9   :  { %1049 = vst [vmem:[%s1515_s8 + $0x20] sm:$0xff] %v1022_v52   ;;  %v785_v56 = vadd.f32 %v926_v59, %v784_v55  ;;  %v1196_v57 = vpop.f32.mrb[22].mxu1 }
 0x2ca   :  { %v796_v62 = vadd.f32 %v1196_v57, %v926_v59  ;;  %v787_v63 = vpop.f32.mrb[23].mxu1  ;;  %v813_v1 = vmax.f32 %v793_v54, 0.0 }
 0x2cb   :  { %v788_v0 = vadd.f32 %v926_v59, %v787_v63  ;;  %v811_v4 = vmax.f32 %v785_v56, 0.0 }
 0x2cc   :  { %v814_v3 = vmax.f32 %v796_v62, 0.0 }
 0x2cd   :  { %v812_v5 = vmax.f32 %v788_v0, 0.0 }
 0x2ce   :  { %v1037_v6 = vpack.c.bf16 %v814_v3, %v813_v1 }
 0x2cf   :  { %v1032_v7 = vpack.c.bf16 %v812_v5, %v811_v4 }
 0x2d0   :  { %1052 = vst [vmem:[%s1515_s8 + $0x38] sm:$0xff] %v1037_v6  }
 0x2d1   :  { %1051 = vst [vmem:[%s1515_s8 + $0x30] sm:$0xff] %v1032_v7  }

</bundles_post_ra>
